<compile_context>
chip_gen: v7x
topology: tpu7x:2x2x1
jax: 0.10.0
libtpu: 0.0.40
codegen_flags: <defaults>
</compile_context>

<pallas_src>
import jax
import jax.numpy as jnp
from jax.experimental import pallas as pl
from jax.experimental.pallas import tpu as pltpu

LANE = 128
SUBLANE = 8


def _round_up(x, m):
    return ((x + m - 1) // m) * m


def _pad2(a, rows, cols):
    return jnp.pad(a, ((0, rows - a.shape[0]), (0, cols - a.shape[1])))


# ---------------------------------------------------------------------------
# Kernels
# ---------------------------------------------------------------------------
def transition_mlp_kernel(xs_ref, xa_ref, w1s_ref, w1a_ref, b1_ref,
                          w2_ref, b2_ref, w3_ref, b3_ref, o_ref):
    """Single-step forward on one batch tile. All tiles are lane-dense (128)."""
    h1 = jnp.dot(xs_ref[...], w1s_ref[...], preferred_element_type=jnp.float32)
    h1 = h1 + jnp.dot(xa_ref[...], w1a_ref[...], preferred_element_type=jnp.float32)
    h1 = jnp.maximum(h1 + b1_ref[...], 0.0)                      # ReLU

    h2 = jnp.dot(h1, w2_ref[...], preferred_element_type=jnp.float32) + b2_ref[...]
    h2 = jnp.maximum(h2, 0.0)                                    # ReLU

    out = jnp.dot(h2, w3_ref[...], preferred_element_type=jnp.float32) + b3_ref[...]
    o_ref[...] = out.astype(o_ref.dtype)


def transition_rollout_kernel(s0_ref, a_ref, w1s_ref, w1a_ref, b1_ref,
                              w2_ref, b2_ref, w3_ref, b3_ref, o_ref, s_scr):
    """grid=(T,): weights resident across all steps, state carried in VMEM scratch."""
    @pl.when(pl.program_id(0) == 0)
    def _():
        s_scr[...] = s0_ref[...].astype(jnp.float32)

    s = s_scr[...]
    a = a_ref[0]

    h1 = jnp.dot(s, w1s_ref[...], preferred_element_type=jnp.float32)
    h1 = h1 + jnp.dot(a, w1a_ref[...], preferred_element_type=jnp.float32)
    h1 = jnp.maximum(h1 + b1_ref[...], 0.0)

    h2 = jnp.dot(h1, w2_ref[...], preferred_element_type=jnp.float32) + b2_ref[...]
    h2 = jnp.maximum(h2, 0.0)

    s_new = jnp.dot(h2, w3_ref[...], preferred_element_type=jnp.float32) + b3_ref[...]
    s_scr[...] = s_new
    o_ref[0] = s_new.astype(o_ref.dtype)


# ---------------------------------------------------------------------------
# Parameter handling
# ---------------------------------------------------------------------------
def init_params(key, state_dim, action_dim, hidden_dim=None, dtype=jnp.float32):
    """Unpadded params, torch.nn.Linear-style init, weight layout [in, out]."""
    if hidden_dim is None:
        hidden_dim = 2 * (state_dim + action_dim)
    in_dim = state_dim + action_dim
    k1, k2, k3, k4, k5, k6 = jax.random.split(key, 6)

    def linear_init(kw, kb, fan_in, fan_out):
        bound = 1.0 / jnp.sqrt(jnp.float32(fan_in))
        w = jax.random.uniform(kw, (fan_in, fan_out), dtype, -bound, bound)
        b = jax.random.uniform(kb, (1, fan_out), dtype, -bound, bound)
        return w, b

    w1, b1 = linear_init(k1, k2, in_dim, hidden_dim)
    w2, b2 = linear_init(k3, k4, hidden_dim, hidden_dim)
    w3, b3 = linear_init(k5, k6, hidden_dim, state_dim)
    return (w1, b1, w2, b2, w3, b3)


def prepare_params(params, state_dim, action_dim):
    """Split W1 into state/action halves and zero-pad all dims to 128 lanes.

    Zero padding is exact: padded input columns hit zero weight rows, padded
    output columns get zero bias (ReLU(0) = 0), so the valid region matches the
    unpadded math bit-for-bit up to accumulation order.
    """
    w1, b1, w2, b2, w3, b3 = params
    hidden_dim = w1.shape[1]
    s_pad = _round_up(state_dim, LANE)
    a_pad = _round_up(action_dim, LANE)
    h_pad = _round_up(hidden_dim, LANE)

    w1s = _pad2(w1[:state_dim], s_pad, h_pad)
    w1a = _pad2(w1[state_dim:], a_pad, h_pad)
    b1p = _pad2(b1, 1, h_pad)
    w2p = _pad2(w2, h_pad, h_pad)
    b2p = _pad2(b2, 1, h_pad)
    w3p = _pad2(w3, h_pad, s_pad)
    b3p = _pad2(b3, 1, s_pad)
    return (w1s, w1a, b1p, w2p, b2p, w3p, b3p)


def _resident_spec(shape):
    """Same block every grid step -> weight stays VMEM-resident."""
    return pl.BlockSpec(shape, lambda *_: (0,) * len(shape))


# ---------------------------------------------------------------------------
# Wrappers
# ---------------------------------------------------------------------------
def transition_model_forward(prev_state, prev_action, padded_params, *, block_batch=256):
    """prev_state: [B, state_dim], prev_action: [B, action_dim] -> [B, state_dim]."""
    w1s, w1a, b1, w2, b2, w3, b3 = padded_params
    batch, state_dim = prev_state.shape
    action_dim = prev_action.shape[1]
    s_pad, h_pad = w1s.shape
    a_pad = w1a.shape[0]
    o_pad = w3.shape[1]

    tb = _round_up(min(block_batch, _round_up(batch, SUBLANE)), SUBLANE)
    bp = _round_up(batch, tb)

    xs = jnp.pad(prev_state, ((0, bp - batch), (0, s_pad - state_dim)))
    xa = jnp.pad(prev_action, ((0, bp - batch), (0, a_pad - action_dim)))

    out = pl.pallas_call(
        transition_mlp_kernel,
        out_shape=jax.ShapeDtypeStruct((bp, o_pad), prev_state.dtype),
        grid=(bp // tb,),
        in_specs=[
            pl.BlockSpec((tb, s_pad), lambda i: (i, 0)),
            pl.BlockSpec((tb, a_pad), lambda i: (i, 0)),
            _resident_spec(w1s.shape), _resident_spec(w1a.shape), _resident_spec(b1.shape),
            _resident_spec(w2.shape), _resident_spec(b2.shape),
            _resident_spec(w3.shape), _resident_spec(b3.shape),
        ],
        out_specs=pl.BlockSpec((tb, o_pad), lambda i: (i, 0)),
        compiler_params=pltpu.CompilerParams(dimension_semantics=("parallel",)),
    )(xs, xa, w1s, w1a, b1, w2, b2, w3, b3)

    return out[:batch, :state_dim]


def transition_model_rollout(init_state, actions, padded_params):
    """Recurrent rollout: init_state [B, state_dim], actions [T, B, action_dim]
    -> all states [T, B, state_dim]. One pallas_call, weights loaded once."""
    w1s, w1a, b1, w2, b2, w3, b3 = padded_params
    T, batch, action_dim = actions.shape
    state_dim = init_state.shape[1]
    s_pad, h_pad = w1s.shape
    a_pad = w1a.shape[0]

    bp = _round_up(batch, SUBLANE)
    s0 = jnp.pad(init_state, ((0, bp - batch), (0, s_pad - state_dim)))
    a = jnp.pad(actions, ((0, 0), (0, bp - batch), (0, a_pad - action_dim)))

    out = pl.pallas_call(
        transition_rollout_kernel,
        out_shape=jax.ShapeDtypeStruct((T, bp, s_pad), init_state.dtype),
        grid=(T,),
        in_specs=[
            pl.BlockSpec((bp, s_pad), lambda t: (0, 0)),
            pl.BlockSpec((1, bp, a_pad), lambda t: (t, 0, 0)),
            _resident_spec(w1s.shape), _resident_spec(w1a.shape), _resident_spec(b1.shape),
            _resident_spec(w2.shape), _resident_spec(b2.shape),
            _resident_spec(w3.shape), _resident_spec(b3.shape),
        ],
        out_specs=pl.BlockSpec((1, bp, s_pad), lambda t: (t, 0, 0)),
        scratch_shapes=[pltpu.VMEM((bp, s_pad), jnp.float32)],
        compiler_params=pltpu.CompilerParams(dimension_semantics=("arbitrary",)),
    )(s0, a, w1s, w1a, b1, w2, b2, w3, b3)

    return out[:, :batch, :state_dim]


# ---------------------------------------------------------------------------
# Demo / correctness check
# ---------------------------------------------------------------------------
if __name__ == "__main__":
    state_dim = 32
    action_dim = 8
    batch = 8
    T = 6

    key = jax.random.PRNGKey(0)
    kp, ks, ka, kr = jax.random.split(key, 4)

    params = init_params(kp, state_dim, action_dim)          # unpadded (reference)
    pparams = prepare_params(params, state_dim, action_dim)  # padded / split (kernel)

    prev_state = jax.random.normal(ks, (batch, state_dim), jnp.float32)
    prev_action = jax.random.normal(ka, (batch, action_dim), jnp.float32)

    # ---- single-step forward ------------------------------------------------
    out = transition_model_forward(prev_state, prev_action, pparams)
    out = jax.block_until_ready(out)

    w1, b1, w2, b2, w3, b3 = params

    def ref_step(s, a):
        x = jnp.concatenate([s, a], axis=1)
        h = jnp.maximum(x @ w1 + b1, 0.0)
        h = jnp.maximum(h @ w2 + b2, 0.0)
        return h @ w3 + b3

    ref = ref_step(prev_state, prev_action)
    assert out.shape == (batch, state_dim)
    assert jnp.allclose(out, ref, atol=1e-5, rtol=1e-5)

    # ---- multi-step rollout (weights resident across T steps) --------------
    actions = jax.random.normal(kr, (T, batch, action_dim), jnp.float32)
    roll = transition_model_rollout(prev_state, actions, pparams)
    roll = jax.block_until_ready(roll)

    s = prev_state
    ref_roll = []
    for t in range(T):
        s = ref_step(s, actions[t])
        ref_roll.append(s)
    ref_roll = jnp.stack(ref_roll)
    assert roll.shape == (T, batch, state_dim)
    assert jnp.allclose(roll, ref_roll, atol=1e-4, rtol=1e-4)

    print("KERNEL_OK")
</pallas_src>

<mosaic_0001>
module attributes {stable_mosaic.version = 11 : i64} {
  func.func @transition_mlp_kernel(%arg0: i32, %arg1: memref<8x128xf32, #tpu.memory_space<vmem>>, %arg2: memref<8x128xf32, #tpu.memory_space<vmem>>, %arg3: memref<128x128xf32, #tpu.memory_space<vmem>>, %arg4: memref<128x128xf32, #tpu.memory_space<vmem>>, %arg5: memref<1x128xf32, #tpu.memory_space<vmem>>, %arg6: memref<128x128xf32, #tpu.memory_space<vmem>>, %arg7: memref<1x128xf32, #tpu.memory_space<vmem>>, %arg8: memref<128x128xf32, #tpu.memory_space<vmem>>, %arg9: memref<1x128xf32, #tpu.memory_space<vmem>>, %arg10: memref<8x128xf32, #tpu.memory_space<vmem>>) attributes {dimension_semantics = [#tpu.dimension_semantics<parallel>], iteration_bounds = array<i64: 1>, scalar_prefetch = 0 : i64, scratch_operands = 0 : i64, tpu.core_type = #tpu.core_type<tc>, window_params = [{transform_indices = @transform_0, window_bounds = array<i64: 8, 128>}, {transform_indices = @transform_1, window_bounds = array<i64: 8, 128>}, {pipeline_mode = #tpu.pipeline_mode<synchronous>, transform_indices = @transform_2, window_bounds = array<i64: 128, 128>}, {pipeline_mode = #tpu.pipeline_mode<synchronous>, transform_indices = @transform_3, window_bounds = array<i64: 128, 128>}, {pipeline_mode = #tpu.pipeline_mode<synchronous>, transform_indices = @transform_4, window_bounds = array<i64: 1, 128>}, {pipeline_mode = #tpu.pipeline_mode<synchronous>, transform_indices = @transform_5, window_bounds = array<i64: 128, 128>}, {pipeline_mode = #tpu.pipeline_mode<synchronous>, transform_indices = @transform_6, window_bounds = array<i64: 1, 128>}, {pipeline_mode = #tpu.pipeline_mode<synchronous>, transform_indices = @transform_7, window_bounds = array<i64: 128, 128>}, {pipeline_mode = #tpu.pipeline_mode<synchronous>, transform_indices = @transform_8, window_bounds = array<i64: 1, 128>}, {transform_indices = @transform_9, window_bounds = array<i64: 8, 128>}]} {
    %c0 = arith.constant 0 : index
    %c0_0 = arith.constant 0 : index
    %0 = vector.load %arg1[%c0, %c0_0] : memref<8x128xf32, #tpu.memory_space<vmem>>, vector<8x128xf32>
    %c0_1 = arith.constant 0 : index
    %c0_2 = arith.constant 0 : index
    %1 = vector.load %arg3[%c0_1, %c0_2] : memref<128x128xf32, #tpu.memory_space<vmem>>, vector<128x128xf32>
    %cst = arith.constant dense<0.000000e+00> : vector<8x128xf32>
    %2 = tpu.matmul %0, %1, %cst {dimension_numbers = #tpu.dot_dimension_numbers<[1], [0], [0], [1], [0, 0, 1, 1], [], []>} : vector<8x128xf32>, vector<128x128xf32>, vector<8x128xf32> -> vector<8x128xf32>
    %c0_3 = arith.constant 0 : index
    %c0_4 = arith.constant 0 : index
    %3 = vector.load %arg2[%c0_3, %c0_4] : memref<8x128xf32, #tpu.memory_space<vmem>>, vector<8x128xf32>
    %c0_5 = arith.constant 0 : index
    %c0_6 = arith.constant 0 : index
    %4 = vector.load %arg4[%c0_5, %c0_6] : memref<128x128xf32, #tpu.memory_space<vmem>>, vector<128x128xf32>
    %cst_7 = arith.constant dense<0.000000e+00> : vector<8x128xf32>
    %5 = tpu.matmul %3, %4, %cst_7 {dimension_numbers = #tpu.dot_dimension_numbers<[1], [0], [0], [1], [0, 0, 1, 1], [], []>} : vector<8x128xf32>, vector<128x128xf32>, vector<8x128xf32> -> vector<8x128xf32>
    %6 = arith.addf %2, %5 : vector<8x128xf32>
    %c0_8 = arith.constant 0 : index
    %c0_9 = arith.constant 0 : index
    %7 = vector.load %arg5[%c0_8, %c0_9] : memref<1x128xf32, #tpu.memory_space<vmem>>, vector<1x128xf32>
    %8 = vector.broadcast %7 : vector<1x128xf32> to vector<8x128xf32>
    %9 = arith.addf %6, %8 : vector<8x128xf32>
    %cst_10 = arith.constant 0.000000e+00 : f32
    %10 = vector.broadcast %cst_10 : f32 to vector<8x128xf32>
    %11 = arith.maximumf %9, %10 : vector<8x128xf32>
    %c0_11 = arith.constant 0 : index
    %c0_12 = arith.constant 0 : index
    %12 = vector.load %arg6[%c0_11, %c0_12] : memref<128x128xf32, #tpu.memory_space<vmem>>, vector<128x128xf32>
    %cst_13 = arith.constant dense<0.000000e+00> : vector<8x128xf32>
    %13 = tpu.matmul %11, %12, %cst_13 {dimension_numbers = #tpu.dot_dimension_numbers<[1], [0], [0], [1], [0, 0, 1, 1], [], []>} : vector<8x128xf32>, vector<128x128xf32>, vector<8x128xf32> -> vector<8x128xf32>
    %c0_14 = arith.constant 0 : index
    %c0_15 = arith.constant 0 : index
    %14 = vector.load %arg7[%c0_14, %c0_15] : memref<1x128xf32, #tpu.memory_space<vmem>>, vector<1x128xf32>
    %15 = vector.broadcast %14 : vector<1x128xf32> to vector<8x128xf32>
    %16 = arith.addf %13, %15 : vector<8x128xf32>
    %cst_16 = arith.constant 0.000000e+00 : f32
    %17 = vector.broadcast %cst_16 : f32 to vector<8x128xf32>
    %18 = arith.maximumf %16, %17 : vector<8x128xf32>
    %c0_17 = arith.constant 0 : index
    %c0_18 = arith.constant 0 : index
    %19 = vector.load %arg8[%c0_17, %c0_18] : memref<128x128xf32, #tpu.memory_space<vmem>>, vector<128x128xf32>
    %cst_19 = arith.constant dense<0.000000e+00> : vector<8x128xf32>
    %20 = tpu.matmul %18, %19, %cst_19 {dimension_numbers = #tpu.dot_dimension_numbers<[1], [0], [0], [1], [0, 0, 1, 1], [], []>} : vector<8x128xf32>, vector<128x128xf32>, vector<8x128xf32> -> vector<8x128xf32>
    %c0_20 = arith.constant 0 : index
    %c0_21 = arith.constant 0 : index
    %21 = vector.load %arg9[%c0_20, %c0_21] : memref<1x128xf32, #tpu.memory_space<vmem>>, vector<1x128xf32>
    %22 = vector.broadcast %21 : vector<1x128xf32> to vector<8x128xf32>
    %23 = arith.addf %20, %22 : vector<8x128xf32>
    %c0_22 = arith.constant 0 : index
    %c0_23 = arith.constant 0 : index
    %24 = vector.load %arg10[%c0_22, %c0_23] : memref<8x128xf32, #tpu.memory_space<vmem>>, vector<8x128xf32>
    tpu.vector_store %arg10[%c0_22, %c0_23], %23 {strides = array<i32>} : memref<8x128xf32, #tpu.memory_space<vmem>>, vector<8x128xf32>,
    return
  }
  func.func @transform_0(%arg0: i32) -> (i32, i32) {
    %c0_i32 = arith.constant 0 : i32
    %c0_i32_0 = arith.constant 0 : i32
    return %arg0, %c0_i32 : i32, i32
  }
  func.func @transform_1(%arg0: i32) -> (i32, i32) {
    %c0_i32 = arith.constant 0 : i32
    %c0_i32_0 = arith.constant 0 : i32
    return %arg0, %c0_i32 : i32, i32
  }
  func.func @transform_2(%arg0: i32) -> (i32, i32) {
    %c0_i32 = arith.constant 0 : i32
    %c0_i32_0 = arith.constant 0 : i32
    %c0_i32_1 = arith.constant 0 : i32
    return %c0_i32, %c0_i32_0 : i32, i32
  }
  func.func @transform_3(%arg0: i32) -> (i32, i32) {
    %c0_i32 = arith.constant 0 : i32
    %c0_i32_0 = arith.constant 0 : i32
    %c0_i32_1 = arith.constant 0 : i32
    return %c0_i32, %c0_i32_0 : i32, i32
  }
  func.func @transform_4(%arg0: i32) -> (i32, i32) {
    %c0_i32 = arith.constant 0 : i32
    %c0_i32_0 = arith.constant 0 : i32
    %c0_i32_1 = arith.constant 0 : i32
    return %c0_i32, %c0_i32_0 : i32, i32
  }
  func.func @transform_5(%arg0: i32) -> (i32, i32) {
    %c0_i32 = arith.constant 0 : i32
    %c0_i32_0 = arith.constant 0 : i32
    %c0_i32_1 = arith.constant 0 : i32
    return %c0_i32, %c0_i32_0 : i32, i32
  }
  func.func @transform_6(%arg0: i32) -> (i32, i32) {
    %c0_i32 = arith.constant 0 : i32
    %c0_i32_0 = arith.constant 0 : i32
    %c0_i32_1 = arith.constant 0 : i32
    return %c0_i32, %c0_i32_0 : i32, i32
  }
  func.func @transform_7(%arg0: i32) -> (i32, i32) {
    %c0_i32 = arith.constant 0 : i32
    %c0_i32_0 = arith.constant 0 : i32
    %c0_i32_1 = arith.constant 0 : i32
    return %c0_i32, %c0_i32_0 : i32, i32
  }
  func.func @transform_8(%arg0: i32) -> (i32, i32) {
    %c0_i32 = arith.constant 0 : i32
    %c0_i32_0 = arith.constant 0 : i32
    %c0_i32_1 = arith.constant 0 : i32
    return %c0_i32, %c0_i32_0 : i32, i32
  }
  func.func @transform_9(%arg0: i32) -> (i32, i32) {
    %c0_i32 = arith.constant 0 : i32
    %c0_i32_0 = arith.constant 0 : i32
    return %arg0, %c0_i32 : i32, i32
  }
}

</mosaic_0001>

<bundles_post_ra>
// kernel: tpu_custom_call.1
= control target key start
LH: loop header
LB: loop body
LE: loop exit
PB: predicated region body
PF: predicated region fallthrough
CT: control target
= control target key end

     0   :  { %14 = vsyncpa [#allocation3], 0  ;;  %s1190_s0 = inlined_call_operand.hbm [shape: f32[8,128], index: 0, kind: input, shape index: {}]   ;;  %s1191_s1 = inlined_call_operand.hbm [shape: f32[8,128], index: 1, kind: input, shape index: {}]   ;;  %s1192_s2 = inlined_call_operand.hbm [shape: f32[128,128], index: 2, kind: input, shape index: {}]   ;;  %s1193_s3 = inlined_call_operand.hbm [shape: f32[128,128], index: 3, kind: input, shape index: {}]   ;;  %s1194_s4 = inlined_call_operand.vmem [shape: f32[1,128], index: 4, kind: input, shape index: {}]   ;;  %s1195_s5 = inlined_call_operand.hbm [shape: f32[128,128], index: 5, kind: input, shape index: {}]   ;;  %s1196_s6 = inlined_call_operand.vmem [shape: f32[1,128], index: 6, kind: input, shape index: {}]   ;;  %s1197_s7 = inlined_call_operand.hbm [shape: f32[128,128], index: 7, kind: input, shape index: {}]   ;;  %s1198_s8 = inlined_call_operand.vmem [shape: f32[1,128], index: 8, kind: input, shape index: {}]   ;;  %s1199_s9 = inlined_call_operand.hbm [shape: f32[8,128], index: 9, kind: output, shape index: {}]  }
   0x1   :  { %15 = vsyncpa [#allocation6], 0 }
   0x2   :  { %16 = vsyncpa [#allocation9], 0 }
   0x3   :  { %17 = vsyncpa [#allocation12], 0 }
   0x4   :  { %18 = vsyncpa [#allocation4], 0  ;;  %s983_s30 = smov [#allocation5]   ;;  %s819_s13 = scalar_lea.hbm %s1191_s1, 128 }
   0x5   :  { %s35_s10 = sshll.u32 %s983_s30, 4  ;;  %p820_p0 = scmp.ne.s32.totalorder %s1191_s1, %s819_s13  ;;  %s36_s10 = int_to_ptr.vmem [resolvable:$true] %s35_s10 }
   0x6   :  { %p823_p1 = scmp.lt.u32.totalorder %s819_s13, %s1191_s1 }
   0x8   :  { %p825_p2 = pnand %p823_p1, %p820_p0 }
   0xa   :  { %828 = shalt.err (!%p825_p2)
}
   0xb   :  { %s829_s18 = scalar_lea.vmem %s36_s10, 128  ;;  %p834_p4 = scmp.lt.s32.totalorder %s36_s10, %s36_s10 }
   0xc   :  { %p830_p3 = scmp.ne.s32.totalorder %s36_s10, %s829_s18  ;;  %p835_p5 = scmp.lt.s32.totalorder %s829_s18, %s829_s18 }
   0xe   :  { %p836_p6 = por %p835_p5, %p834_p4 }
  0x10   :  { %p837_p7 = pnand %p836_p6, %p830_p3 }
  0x12   :  { %840 = shalt.err (!%p837_p7)
}
  0x13   :  { %38 = dma.hbm_to_vmem [thread:$0]  %s1191_s1, 128, %s36_s10, [#allocation6]  }
  0x14   :  { %s984_s21 = smov [#allocation8]   ;;  %s985_s23 = smov [#allocation2]  }
  0x15   :  { %s56_s22 = sshll.u32 %s984_s21, 4  ;;  %s25_s24 = sshll.u32 %s985_s23, 4  ;;  %s57_s22 = int_to_ptr.vmem [resolvable:$true] %s56_s22  ;;  %s26_s24 = int_to_ptr.vmem [resolvable:$true] %s25_s24 }
  0x16   :  { %s841_s27 = scalar_lea.hbm %s1193_s3, 2048 }
  0x17   :  { %p842_p8 = scmp.ne.s32.totalorder %s1193_s3, %s841_s27  ;;  %p845_p9 = scmp.lt.u32.totalorder %s841_s27, %s1193_s3 }
  0x19   :  { %p847_p10 = pnand %p845_p9, %p842_p8 }
  0x1b   :  { %850 = shalt.err (!%p847_p10)
}
  0x1c   :  { %s851_s1 = scalar_lea.vmem %s57_s22, 2048  ;;  %p856_p12 = scmp.lt.s32.totalorder %s57_s22, %s57_s22 }
  0x1d   :  { %p852_p11 = scmp.ne.s32.totalorder %s57_s22, %s851_s1  ;;  %p857_p13 = scmp.lt.s32.totalorder %s851_s1, %s851_s1 }
  0x1f   :  { %p858_p0 = por %p857_p13, %p856_p12 }
  0x21   :  { %p859_p1 = pnand %p858_p0, %p852_p11 }
  0x23   :  { %862 = shalt.err (!%p859_p1)
}
  0x24   :  { %s986_s10 = smov 128   ;;  %s987_s12 = smov 8  }
  0x25   :  { %62 = dma.hbm_to_vmem [thread:$0]  %s1193_s3, 2048, %s57_s22, [#allocation9], %s986_s10, %s986_s10, %s987_s12  }
  0x26   :  { %s863_s17 = scalar_lea.hbm %s1190_s0, 128 }
  0x27   :  { %p864_p2 = scmp.ne.s32.totalorder %s1190_s0, %s863_s17  ;;  %p867_p3 = scmp.lt.u32.totalorder %s863_s17, %s1190_s0 }
  0x29   :  { %p869_p4 = pnand %p867_p3, %p864_p2 }
  0x2b   :  { %872 = shalt.err (!%p869_p4)
}
  0x2c   :  { %s873_s23 = scalar_lea.vmem %s26_s24, 128  ;;  %p878_p6 = scmp.lt.s32.totalorder %s26_s24, %s26_s24 }
  0x2d   :  { %p874_p5 = scmp.ne.s32.totalorder %s26_s24, %s873_s23  ;;  %p879_p7 = scmp.lt.s32.totalorder %s873_s23, %s873_s23 }
  0x2f   :  { %p880_p8 = por %p879_p7, %p878_p6 }
  0x31   :  { %p881_p9 = pnand %p880_p8, %p874_p5 }
  0x33   :  { %884 = shalt.err (!%p881_p9)
}
  0x34   :  { %28 = dma.hbm_to_vmem [thread:$0]  %s1190_s0, 128, %s26_s24, [#allocation3]  }
  0x35   :  { %s988_s25 = smov [#allocation7]   ;;  %s989_s27 = smov [#allocation10]  }
  0x36   :  { %s44_s26 = sshll.u32 %s988_s25, 4  ;;  %s70_s28 = sshll.u32 %s989_s27, 4  ;;  %s45_s26 = int_to_ptr.vmem [resolvable:$true] %s44_s26  ;;  %s71_s28 = int_to_ptr.vmem [resolvable:$true] %s70_s28 }
  0x37   :  { %s885_s11 = scalar_lea.hbm %s1192_s2, 2048 }
  0x38   :  { %p886_p10 = scmp.ne.s32.totalorder %s1192_s2, %s885_s11  ;;  %p889_p11 = scmp.lt.u32.totalorder %s885_s11, %s1192_s2 }
  0x3a   :  { %p891_p12 = pnand %p889_p11, %p886_p10 }
  0x3c   :  { %894 = shalt.err (!%p891_p12)
}
  0x3d   :  { %s895_s0 = scalar_lea.vmem %s45_s26, 2048  ;;  %p900_p0 = scmp.lt.s32.totalorder %s45_s26, %s45_s26 }
  0x3e   :  { %p896_p13 = scmp.ne.s32.totalorder %s45_s26, %s895_s0  ;;  %p901_p1 = scmp.lt.s32.totalorder %s895_s0, %s895_s0 }
  0x40   :  { %p902_p2 = por %p901_p1, %p900_p0 }
  0x42   :  { %p903_p3 = pnand %p902_p2, %p896_p13 }
  0x44   :  { %906 = shalt.err (!%p903_p3)
}
  0x45   :  { %50 = dma.hbm_to_vmem [thread:$0]  %s1192_s2, 2048, %s45_s26, [#allocation6], %s986_s10, %s986_s10, %s987_s12  }
  0x46   :  { %s907_s19 = scalar_lea.hbm %s1195_s5, 2048 }
  0x47   :  { %p908_p4 = scmp.ne.s32.totalorder %s1195_s5, %s907_s19  ;;  %p911_p5 = scmp.lt.u32.totalorder %s907_s19, %s1195_s5 }
  0x49   :  { %p913_p6 = pnand %p911_p5, %p908_p4 }
  0x4b   :  { %916 = shalt.err (!%p913_p6)
}
  0x4c   :  { %s917_s22 = scalar_lea.vmem %s71_s28, 2048  ;;  %p922_p8 = scmp.lt.s32.totalorder %s71_s28, %s71_s28 }
  0x4d   :  { %p918_p7 = scmp.ne.s32.totalorder %s71_s28, %s917_s22  ;;  %p923_p9 = scmp.lt.s32.totalorder %s917_s22, %s917_s22 }
  0x4f   :  { %p924_p10 = por %p923_p9, %p922_p8 }
  0x51   :  { %p925_p11 = pnand %p924_p10, %p918_p7 }
  0x53   :  { %928 = shalt.err (!%p925_p11)
}
  0x54   :  { %76 = dma.hbm_to_vmem [thread:$0]  %s1195_s5, 2048, %s71_s28, [#allocation9], %s986_s10, %s986_s10, %s987_s12  }
  0x55   :  { %s990_s26 = smov [#allocation11]   ;;  %s929_s11 = scalar_lea.hbm %s1197_s7, 2048 }
  0x56   :  { %s84_s27 = sshll.u32 %s990_s26, 4  ;;  %p930_p12 = scmp.ne.s32.totalorder %s1197_s7, %s929_s11  ;;  %s85_s27 = int_to_ptr.vmem [resolvable:$true] %s84_s27 }
  0x57   :  { %p933_p13 = scmp.lt.u32.totalorder %s929_s11, %s1197_s7 }
  0x59   :  { %p935_p0 = pnand %p933_p13, %p930_p12 }
  0x5b   :  { %938 = shalt.err (!%p935_p0)
}
  0x5c   :  { %s939_s0 = scalar_lea.vmem %s85_s27, 2048  ;;  %p944_p2 = scmp.lt.s32.totalorder %s85_s27, %s85_s27 }
  0x5d   :  { %p940_p1 = scmp.ne.s32.totalorder %s85_s27, %s939_s0  ;;  %p945_p3 = scmp.lt.s32.totalorder %s939_s0, %s939_s0 }
  0x5f   :  { %p946_p4 = por %p945_p3, %p944_p2 }
  0x61   :  { %p947_p5 = pnand %p946_p4, %p940_p1 }
  0x63   :  { %950 = shalt.err (!%p947_p5)
}
  0x64   :  { %90 = dma.hbm_to_vmem [thread:$0]  %s1197_s7, 2048, %s85_s27, [#allocation12], %s986_s10, %s986_s10, %s987_s12  }
  0x65   :  { %973 = dma.done.wait [#allocation3], 128  }
  0x66   :  { %974 = vsyncadd [#allocation3], 4294967168 }
  0x67   :  { %975 = dma.done.wait [#allocation6], 2176  }
  0x68   :  { %976 = vsyncadd [#allocation6], 4294965120 }
  0x69   :  { %977 = dma.done.wait [#allocation9], 4096  }
  0x6a   :  { %978 = vsyncadd [#allocation9], 4294963200 }
  0x6b   :  { %979 = dma.done.wait [#allocation12], 2048  }
  0x6c   :  { %980 = vsyncadd [#allocation12], 4294965248  ;;  %v991_v0 = vmov 0.0|0.0   ;;  %vm992_vm0 = vmmov 0   ;;  %v993_v1 = vmov 0.0   ;;  %v129_v2 = vld [vmem:[#allocation8] sm:$0xff] }
  0x6d   :  { %711 = vmatprep.subr.bf16.mxu0 %v991_v0  ;;  %735 = vmatprep.subr.bf16.mxu1 %v991_v0  ;;  %v130_v3 = vld [vmem:[#allocation8 + $0x8] sm:$0xff]  ;;  %v112_v4 = vld [vmem:[#allocation7] sm:$0xff]  ;;  %v131_v7 = vld [vmem:[#allocation8 + $0x10] sm:$0xff]  ;;  %s994_s17 = smov [#allocation13]  }
  0x6e   :  { %603 = vmatprep.mubr.msk.f32.mxu0 %vm992_vm0, %v993_v1  ;;  %638 = vmatprep.mubr.msk.f32.mxu1 %vm992_vm0, %v993_v1  ;;  %v712_v5 = vpack.c.bf16 %v130_v3, %v129_v2  ;;  %v113_v6 = vld [vmem:[#allocation7 + $0x8] sm:$0xff]  ;;  %v132_v8 = vld [vmem:[#allocation8 + $0x18] sm:$0xff]  ;;  %v114_v10 = vld [vmem:[#allocation7 + $0x10] sm:$0xff]  ;;  %s488_s18 = sshll.u32 %s994_s17, 4  ;;  %s489_s18 = int_to_ptr.vmem [resolvable:$true] %s488_s18 }
  0x6f   :  { %v736_v9 = vpack.c.bf16 %v113_v6, %v112_v4  ;;  %v115_v11 = vld [vmem:[#allocation7 + $0x18] sm:$0xff]  ;;  %v715_v12 = vpack.c.bf16 %v132_v8, %v131_v7  ;;  %v133_v14 = vld [vmem:[#allocation8 + $0x20] sm:$0xff]  ;;  %v134_v15 = vld [vmem:[#allocation8 + $0x28] sm:$0xff]  ;;  %s951_s19 = scalar_lea.vmem %s489_s18, 128  ;;  %p956_p7 = scmp.lt.s32.totalorder %s489_s18, %s489_s18 }
  0x70   :  { %713 = vmatpush3.bf16.msra.mxu0 %v712_v5  ;;  %v739_v13 = vpack.c.bf16 %v115_v11, %v114_v10  ;;  %v116_v16 = vld [vmem:[#allocation7 + $0x20] sm:$0xff]  ;;  %v117_v17 = vld [vmem:[#allocation7 + $0x28] sm:$0xff]  ;;  %v718_v18 = vpack.c.bf16 %v134_v15, %v133_v14  ;;  %v135_v20 = vld [vmem:[#allocation8 + $0x30] sm:$0xff]  ;;  %p952_p6 = scmp.ne.s32.totalorder %s489_s18, %s951_s19  ;;  %p957_p8 = scmp.lt.s32.totalorder %s951_s19, %s951_s19 }
  0x71   :  { %737 = vmatpush3.bf16.msra.mxu1 %v736_v9  ;;  %714 = vmatprep.subr.bf16.mxu0 %v991_v0  ;;  %v742_v19 = vpack.c.bf16 %v117_v17, %v116_v16  ;;  %v136_v21 = vld [vmem:[#allocation8 + $0x38] sm:$0xff]  ;;  %v118_v22 = vld [vmem:[#allocation7 + $0x30] sm:$0xff]  ;;  %v137_v26 = vld [vmem:[#allocation8 + $0x40] sm:$0xff] }
  0x72   :  { %738 = vmatprep.subr.bf16.mxu1 %v991_v0  ;;  %v119_v23 = vld [vmem:[#allocation7 + $0x38] sm:$0xff]  ;;  %v721_v24 = vpack.c.bf16 %v136_v21, %v135_v20  ;;  %v138_v27 = vld [vmem:[#allocation8 + $0x48] sm:$0xff]  ;;  %v120_v28 = vld [vmem:[#allocation7 + $0x40] sm:$0xff]  ;;  %p958_p9 = por %p957_p8, %p956_p7 }
  0x73   :  { %v745_v25 = vpack.c.bf16 %v119_v23, %v118_v22  ;;  %v121_v29 = vld [vmem:[#allocation7 + $0x48] sm:$0xff]  ;;  %v724_v30 = vpack.c.bf16 %v138_v27, %v137_v26  ;;  %v139_v32 = vld [vmem:[#allocation8 + $0x50] sm:$0xff]  ;;  %v140_v33 = vld [vmem:[#allocation8 + $0x58] sm:$0xff] }
  0x74   :  { %716 = vmatpush3.bf16.msra.mxu0 %v715_v12  ;;  %v748_v31 = vpack.c.bf16 %v121_v29, %v120_v28  ;;  %v122_v34 = vld [vmem:[#allocation7 + $0x50] sm:$0xff]  ;;  %v123_v35 = vld [vmem:[#allocation7 + $0x58] sm:$0xff]  ;;  %v727_v36 = vpack.c.bf16 %v140_v33, %v139_v32  ;;  %v141_v38 = vld [vmem:[#allocation8 + $0x60] sm:$0xff]  ;;  %p959_p10 = pnand %p958_p9, %p952_p6 }
  0x75   :  { %740 = vmatpush3.bf16.msra.mxu1 %v739_v13  ;;  %717 = vmatprep.subr.bf16.mxu0 %v991_v0  ;;  %v751_v37 = vpack.c.bf16 %v123_v35, %v122_v34  ;;  %v142_v39 = vld [vmem:[#allocation8 + $0x68] sm:$0xff]  ;;  %v124_v40 = vld [vmem:[#allocation7 + $0x60] sm:$0xff]  ;;  %v143_v44 = vld [vmem:[#allocation8 + $0x70] sm:$0xff] }
  0x76   :  { %741 = vmatprep.subr.bf16.mxu1 %v991_v0  ;;  %v125_v41 = vld [vmem:[#allocation7 + $0x68] sm:$0xff]  ;;  %v730_v42 = vpack.c.bf16 %v142_v39, %v141_v38  ;;  %v144_v45 = vld [vmem:[#allocation8 + $0x78] sm:$0xff]  ;;  %v126_v46 = vld [vmem:[#allocation7 + $0x70] sm:$0xff] }
  0x77   :  { %v754_v43 = vpack.c.bf16 %v125_v41, %v124_v40  ;;  %v127_v47 = vld [vmem:[#allocation7 + $0x78] sm:$0xff]  ;;  %v733_v48 = vpack.c.bf16 %v144_v45, %v143_v44  ;;  %v294_v50 = vld [vmem:[#allocation10] sm:$0xff]  ;;  %v295_v51 = vld [vmem:[#allocation10 + $0x8] sm:$0xff] }
  0x78   :  { %719 = vmatpush3.bf16.msra.mxu0 %v718_v18  ;;  %v757_v49 = vpack.c.bf16 %v127_v47, %v126_v46  ;;  %v128_v52 = vld [vmem:[#allocation5] sm:$0xff]  ;;  %v760_v53 = vpack.c.bf16 %v295_v51, %v294_v50  ;;  %v111_v54 = vld [vmem:[#allocation2] sm:$0xff]  ;;  %v298_v58 = vld [vmem:[#allocation10 + $0x20] sm:$0xff] }
  0x79   :  { %743 = vmatpush3.bf16.msra.mxu1 %v742_v19  ;;  %720 = vmatprep.subr.bf16.mxu0 %v991_v0  ;;  %v296_v55 = vld [vmem:[#allocation10 + $0x10] sm:$0xff]  ;;  %v297_v56 = vld [vmem:[#allocation10 + $0x18] sm:$0xff]  ;;  %v299_v59 = vld [vmem:[#allocation10 + $0x28] sm:$0xff] }
  0x7a   :  { %744 = vmatprep.subr.bf16.mxu1 %v991_v0  ;;  %v763_v57 = vpack.c.bf16 %v297_v56, %v296_v55  ;;  %v766_v60 = vpack.c.bf16 %v299_v59, %v298_v58  ;;  %v300_v61 = vld [vmem:[#allocation10 + $0x30] sm:$0xff]  ;;  %v301_v62 = vld [vmem:[#allocation10 + $0x38] sm:$0xff]  ;;  %v302_v2 = vld [vmem:[#allocation10 + $0x40] sm:$0xff] }
  0x7b   :  { %v769_v63 = vpack.c.bf16 %v301_v62, %v300_v61  ;;  %v303_v3 = vld [vmem:[#allocation10 + $0x48] sm:$0xff]  ;;  %v304_v5 = vld [vmem:[#allocation10 + $0x50] sm:$0xff]  ;;  %v305_v6 = vld [vmem:[#allocation10 + $0x58] sm:$0xff] }
  0x7c   :  { %722 = vmatpush3.bf16.msra.mxu0 %v721_v24  ;;  %v772_v4 = vpack.c.bf16 %v303_v3, %v302_v2  ;;  %v306_v7 = vld [vmem:[#allocation10 + $0x60] sm:$0xff]  ;;  %v307_v8 = vld [vmem:[#allocation10 + $0x68] sm:$0xff]  ;;  %v308_v10 = vld [vmem:[#allocation10 + $0x70] sm:$0xff] }
  0x7d   :  { %746 = vmatpush3.bf16.msra.mxu1 %v745_v25  ;;  %723 = vmatprep.subr.bf16.mxu0 %v991_v0  ;;  %v778_v9 = vpack.c.bf16 %v307_v8, %v306_v7  ;;  %v309_v11 = vld [vmem:[#allocation10 + $0x78] sm:$0xff]  ;;  %v388_v13 = vld [vmem:[#allocation11] sm:$0xff]  ;;  %v389_v14 = vld [vmem:[#allocation11 + $0x8] sm:$0xff] }
  0x7e   :  { %747 = vmatprep.subr.bf16.mxu1 %v991_v0  ;;  %v781_v12 = vpack.c.bf16 %v309_v11, %v308_v10  ;;  %v390_v15 = vld [vmem:[#allocation11 + $0x10] sm:$0xff]  ;;  %v784_v16 = vpack.c.bf16 %v389_v14, %v388_v13  ;;  %v391_v17 = vld [vmem:[#allocation11 + $0x18] sm:$0xff]  ;;  %v392_v19 = vld [vmem:[#allocation11 + $0x20] sm:$0xff] }
  0x7f   :  { %v787_v18 = vpack.c.bf16 %v391_v17, %v390_v15  ;;  %v393_v20 = vld [vmem:[#allocation11 + $0x28] sm:$0xff]  ;;  %v394_v22 = vld [vmem:[#allocation11 + $0x30] sm:$0xff]  ;;  %v395_v23 = vld [vmem:[#allocation11 + $0x38] sm:$0xff] }
  0x80   :  { %725 = vmatpush3.bf16.msra.mxu0 %v724_v30  ;;  %v790_v21 = vpack.c.bf16 %v393_v20, %v392_v19  ;;  %v793_v24 = vpack.c.bf16 %v395_v23, %v394_v22  ;;  %v396_v25 = vld [vmem:[#allocation11 + $0x40] sm:$0xff]  ;;  %v397_v26 = vld [vmem:[#allocation11 + $0x48] sm:$0xff]  ;;  %v398_v28 = vld [vmem:[#allocation11 + $0x50] sm:$0xff] }
  0x81   :  { %749 = vmatpush3.bf16.msra.mxu1 %v748_v31  ;;  %726 = vmatprep.subr.bf16.mxu0 %v991_v0  ;;  %v796_v27 = vpack.c.bf16 %v397_v26, %v396_v25  ;;  %v399_v29 = vld [vmem:[#allocation11 + $0x58] sm:$0xff]  ;;  %v400_v31 = vld [vmem:[#allocation11 + $0x60] sm:$0xff]  ;;  %v401_v32 = vld [vmem:[#allocation11 + $0x68] sm:$0xff] }
  0x82   :  { %750 = vmatprep.subr.bf16.mxu1 %v991_v0  ;;  %v799_v30 = vpack.c.bf16 %v399_v29, %v398_v28  ;;  %v802_v33 = vpack.c.bf16 %v401_v32, %v400_v31 }
  0x84   :  { %728 = vmatpush3.bf16.msra.mxu0 %v727_v36  ;;  %v500_v36 = vld [vmem:[%s1194_s4] ss:$0 sm:$0xff] }
  0x85   :  { %752 = vmatpush3.bf16.msra.mxu1 %v751_v37  ;;  %729 = vmatprep.subr.bf16.mxu0 %v991_v0 }
  0x86   :  { %753 = vmatprep.subr.bf16.mxu1 %v991_v0 }
  0x88   :  { %731 = vmatpush3.bf16.msra.mxu0 %v730_v42  ;;  %v402_v42 = vld [vmem:[#allocation11 + $0x70] sm:$0xff] }
  0x89   :  { %755 = vmatpush3.bf16.msra.mxu1 %v754_v43  ;;  %732 = vmatprep.subr.bf16.mxu0 %v991_v0  ;;  %v403_v43 = vld [vmem:[#allocation11 + $0x78] sm:$0xff] }
  0x8a   :  { %756 = vmatprep.subr.bf16.mxu1 %v991_v0  ;;  %v805_v44 = vpack.c.bf16 %v403_v43, %v402_v42 }
  0x8c   :  { %734 = vmatpush3.bf16.msra.mxu0 %v733_v48 }
  0x8d   :  { %758 = vmatpush3.bf16.msra.mxu1 %v757_v49  ;;  %759 = vmatprep.subr.bf16.mxu0 %v991_v0  ;;  %v502_v49 = vld [vmem:[%s1198_s8] ss:$0 sm:$0xff] }
  0x8e   :  { %783 = vmatprep.subr.bf16.mxu1 %v991_v0 }
  0x8f   :  { %604 = vmatmul.mubr.f32.vlgmr.msra.gmra.mrb[0].mxu0 %v128_v52 }
  0x90   :  { %639 = vmatmul.mubr.f32.vlgmr.msra.gmra.mrb[0].mxu1 %v111_v54  ;;  %761 = vmatpush3.bf16.msra.mxu0 %v760_v53 }
  0x91   :  { %762 = vmatprep.subr.bf16.mxu0 %v991_v0  ;;  %673 = vmatprep.mubr.msk.f32.mxu0 %vm992_vm0, %v993_v1 }
  0x92   :  { %708 = vmatprep.mubr.msk.f32.mxu1 %vm992_vm0, %v993_v1  ;;  %v775_v1 = vpack.c.bf16 %v305_v6, %v304_v5  ;;  %785 = vmatpush3.bf16.msra.mxu1 %v784_v16 }
  0x93   :  { %786 = vmatprep.subr.bf16.mxu1 %v991_v0 }
  0x94   :  { %764 = vmatpush3.bf16.msra.mxu0 %v763_v57 }
  0x95   :  { %765 = vmatprep.subr.bf16.mxu0 %v991_v0 }
  0x96   :  { %788 = vmatpush3.bf16.msra.mxu1 %v787_v18 }
  0x97   :  { %789 = vmatprep.subr.bf16.mxu1 %v991_v0 }
  0x98   :  { %767 = vmatpush3.bf16.msra.mxu0 %v766_v60 }
  0x99   :  { %768 = vmatprep.subr.bf16.mxu0 %v991_v0 }
  0x9a   :  { %791 = vmatpush3.bf16.msra.mxu1 %v790_v21 }
  0x9b   :  { %792 = vmatprep.subr.bf16.mxu1 %v991_v0 }
  0x9c   :  { %770 = vmatpush3.bf16.msra.mxu0 %v769_v63 }
  0x9d   :  { %771 = vmatprep.subr.bf16.mxu0 %v991_v0 }
  0x9e   :  { %794 = vmatpush3.bf16.msra.mxu1 %v793_v24 }
  0x9f   :  { %795 = vmatprep.subr.bf16.mxu1 %v991_v0 }
  0xa0   :  { %773 = vmatpush3.bf16.msra.mxu0 %v772_v4 }
  0xa1   :  { %774 = vmatprep.subr.bf16.mxu0 %v991_v0 }
  0xa2   :  { %797 = vmatpush3.bf16.msra.mxu1 %v796_v27 }
  0xa3   :  { %798 = vmatprep.subr.bf16.mxu1 %v991_v0 }
  0xa4   :  { %776 = vmatpush3.bf16.msra.mxu0 %v775_v1 }
  0xa5   :  { %777 = vmatprep.subr.bf16.mxu0 %v991_v0 }
  0xa6   :  { %800 = vmatpush3.bf16.msra.mxu1 %v799_v30 }
  0xa7   :  { %801 = vmatprep.subr.bf16.mxu1 %v991_v0 }
  0xa8   :  { %779 = vmatpush3.bf16.msra.mxu0 %v778_v9 }
  0xa9   :  { %780 = vmatprep.subr.bf16.mxu0 %v991_v0 }
  0xaa   :  { %803 = vmatpush3.bf16.msra.mxu1 %v802_v33 }
  0xab   :  { %804 = vmatprep.subr.bf16.mxu1 %v991_v0  ;;  %v501_v0 = vld [vmem:[%s1196_s6] ss:$0 sm:$0xff] }
  0xac   :  { %782 = vmatpush3.bf16.msra.mxu0 %v781_v12 }
  0xae   :  { %806 = vmatpush3.bf16.msra.mxu1 %v805_v44 }
 0x162   :  { %v211_v34 = vpop.f32.mrb[0].mxu0 }
 0x163   :  { %v281_v35 = vpop.f32.mrb[0].mxu1  ;;  %v605_v37 = vpop.f32.mrb[1].mxu0 }
 0x164   :  { %v282_v38 = vadd.f32 %v281_v35, %v211_v34  ;;  %v640_v39 = vpop.f32.mrb[1].mxu1 }
 0x166   :  { %v292_v40 = vadd.f32 %v500_v36, %v282_v38 }
 0x168   :  { %v293_v41 = vmax.f32 %v292_v40, 0.0 }
 0x16a   :  { %674 = vmatmul.mubr.f32.vlgmr.msra.gmra.mrb[2].mxu0 %v293_v41 }
 0x23d   :  { %v383_v45 = vpop.f32.mrb[2].mxu0 }
 0x23e   :  { %v384_v46 = vadd.f32 %v501_v0, %v383_v45  ;;  %v675_v47 = vpop.f32.mrb[3].mxu0 }
 0x240   :  { %v387_v48 = vmax.f32 %v384_v46, 0.0 }
 0x242   :  { %709 = vmatmul.mubr.f32.vlgmr.msra.gmra.mrb[2].mxu1 %v387_v48 }
 0x315   :  { %v477_v50 = vpop.f32.mrb[2].mxu1 }
 0x316   :  { %v478_v51 = vadd.f32 %v502_v49, %v477_v50  ;;  %v710_v52 = vpop.f32.mrb[3].mxu1 }
 0x318   :  { %481 = vst [vmem:[#allocation13] sm:$0xff] %v478_v51 }
 0x319   :  { %962 = shalt.err (!%p959_p10)
}
 0x31a   :  { %s963_s21 = scalar_lea.hbm %s1199_s9, 128 }
 0x31b   :  { %p964_p11 = scmp.ne.s32.totalorder %s1199_s9, %s963_s21  ;;  %p967_p12 = scmp.lt.u32.totalorder %s963_s21, %s1199_s9 }
 0x31d   :  { %p969_p13 = pnand %p967_p12, %p964_p11 }
 0x31f   :  { %972 = shalt.err (!%p969_p13)
}
 0x320   :  { %491 = dma.vmem_to_hbm [thread:$0]  %s489_s18, 128, %s1199_s9, [#allocation4]  }
 0x321   :  { %981 = dma.done.wait [#allocation4], 128  }
 0x322   :  { %982 = vsyncadd [#allocation4], 4294967168 }
 0x323   :  { %495 = vsyncpa [#allocation3], 1 }
 0x324   :  { %496 = vsyncpa [#allocation6], 1 }
 0x325   :  { %497 = vsyncpa [#allocation9], 1 }
 0x326   :  { %498 = vsyncpa [#allocation12], 1 }
 0x327   :  { %499 = vsyncpa [#allocation4], 1 }

</bundles_post_ra>
